<compile_context>
chip_gen: v7x
topology: tpu7x:2x2x1
jax: 0.10.0
libtpu: 0.0.40
codegen_flags: <defaults>
</compile_context>

<pallas_src>
import jax
import jax.numpy as jnp
from jax.experimental import pallas as pl
from jax.experimental.pallas import tpu as pltpu

_LANE = 128
_SUBLANE = 8


# --------------------------------------------------------------------------
# Hardware / VMEM budgeting
# --------------------------------------------------------------------------
def _vmem_capacity_bytes() -> int:
    """Per-TensorCore VMEM capacity; conservative 64 MiB fallback (v7x-safe)."""
    try:
        return int(pltpu.get_tpu_info().vmem_capacity_bytes)
    except Exception:
        return 64 * 1024 * 1024


def _pad(v: int, m: int) -> int:
    return ((v + m - 1) // m) * m


def _tile_bytes(shape, itemsize: int) -> int:
    """Rough VMEM footprint of one buffer, last two dims padded to (8, 128)."""
    padded = list(shape)
    padded[-1] = _pad(padded[-1], _LANE)
    if len(padded) >= 2:
        padded[-2] = _pad(padded[-2], _SUBLANE)
    total = 1
    for d in padded:
        total *= d
    return total * itemsize


def _vmem_estimate(bn, batch, tk, tn, x_b, w_b, o_b, bias_rows, b_b,
                   has_bias, use_scratch) -> int:
    total = 2 * _tile_bytes((bn, batch, tk), x_b)       # double-buffered x block
    total += 2 * _tile_bytes((bn, tk, tn), w_b)         # double-buffered weight block
    total += 2 * _tile_bytes((bn, batch, tn), o_b)      # double-buffered out block
    if has_bias:
        total += 2 * _tile_bytes((bias_rows, tn), b_b)  # (resident) bias block
    if use_scratch:
        total += _tile_bytes((bn, batch, tn), 4)        # f32 accumulator scratch
    return total


def _candidates(dim: int, cap=None):
    """Tile candidates, preference order: full dim, then 128-mult divisors (desc)."""
    cands = []
    if cap is None or dim <= cap:
        cands.append(dim)
    t = (dim // _LANE) * _LANE
    if cap is not None:
        t = min(t, (cap // _LANE) * _LANE)
    while t >= _LANE:
        if t != dim and dim % t == 0:
            cands.append(t)
        t -= _LANE
    if not cands:
        cands.append(dim)  # no lane-aligned divisor; fall back to the full dim
    return cands


def _choose_tiles(n, batch, in_f, out_f, x_b, w_b, o_b, bias_rows, b_b,
                  has_bias, use_scratch, budget, two_tc_hint):
    def fits(bn, tk, tn):
        return _vmem_estimate(bn, batch, tk, tn, x_b, w_b, o_b, bias_rows, b_b,
                              has_bias, use_scratch) <= budget

    # K tile: lane-aligned divisor (<=512); K tiling only amortizes step overhead,
    # it never causes HBM re-fetch, so stay modest and spend VMEM on tn / bn.
    tk = _candidates(in_f, cap=512)[0]

    # N tile: as large as the budget allows.  tn == out_features makes the
    # x BlockSpec's index map independent of j -> x is DMA'd exactly once.
    tn_cands = _candidates(out_f)
    tn = tn_cands[-1]
    for c in tn_cands:
        if fits(1, tk, c):
            tn = c
            break

    # n block: largest divisor of n that still fits the budget.
    bn = 1
    for d in range(1, n + 1):
        if n % d == 0 and fits(d, tk, tn):
            bn = d

    # v7x-style megacore (2 TCs, 64 MiB each): make sure the parallel grid axes
    # provide >= 2 tiles so both cores get work.  Skip on single-TC chips.
    if two_tc_hint and n >= 2 and (n // bn) * (out_f // tn) < 2:
        for d in range(n // 2, 0, -1):
            if n % d == 0 and fits(d, tk, tn):
                bn = d
                break

    return bn, tk, tn


# --------------------------------------------------------------------------
# Kernels
# --------------------------------------------------------------------------
def _dot_block(x_blk, w_blk):
    # (bn, batch, tk) @ (bn, tk, tn) -> (bn, batch, tn), batched over the n axis,
    # f32 accumulation on the MXU.
    return jax.lax.dot_general(
        x_blk, w_blk,
        dimension_numbers=(((2,), (1,)), ((0,), (0,))),
        preferred_element_type=jnp.float32)


def _make_kernel(has_bias: bool, use_scratch: bool):
    if use_scratch:
        # Low-precision output: accumulate in an f32 VMEM scratch, cast at the end.
        def kernel(*refs):
            if has_bias:
                x_ref, w_ref, b_ref, o_ref, acc_ref = refs
            else:
                x_ref, w_ref, o_ref, acc_ref = refs
            k = pl.program_id(2)

            @pl.when(k == 0)
            def _init():
                acc_ref[...] = jnp.zeros_like(acc_ref)

            acc_ref[...] += _dot_block(x_ref[...], w_ref[...])

            @pl.when(k == pl.num_programs(2) - 1)
            def _finalize():
                acc = acc_ref[...]
                if has_bias:
                    acc = acc + b_ref[...].astype(jnp.float32)[None]
                o_ref[...] = acc.astype(o_ref.dtype)
    else:
        # f32 output: the output block index ignores k, so the block is resident
        # across the whole K sweep -- accumulate straight into it (no scratch).
        def kernel(*refs):
            if has_bias:
                x_ref, w_ref, b_ref, o_ref = refs
            else:
                x_ref, w_ref, o_ref = refs
            k = pl.program_id(2)

            @pl.when(k == 0)
            def _init():
                if has_bias:
                    # Seed with the bias once (single hoisted broadcast); no epilogue.
                    o_ref[...] = jnp.broadcast_to(
                        b_ref[...].astype(o_ref.dtype)[None], o_ref.shape)
                else:
                    o_ref[...] = jnp.zeros_like(o_ref)

            o_ref[...] += _dot_block(x_ref[...], w_ref[...])

    return kernel


# --------------------------------------------------------------------------
# Wrapper
# --------------------------------------------------------------------------
def nlinear_forward(x, weight, bias=None):
    """x: (batch, n, in); weight: (n, in, out); bias: (n, out) or None.

    Returns (n, batch, out), exactly like the PyTorch module's forward.
    """
    if x.ndim != 3:
        raise ValueError("error")
    assert x.shape[-(weight.ndim - 1):] == weight.shape[:-1]

    batch, n, in_features = x.shape
    out_features = weight.shape[-1]

    has_bias = bias is not None
    if has_bias:
        assert bias.shape == (n, out_features)
        # torch's (n, batch, out) + (n, out) broadcast indexes bias by the *batch*
        # dimension (adds bias[b] to batch row b) and requires n == batch.
        # Kept exactly, as in the reference module.
        assert n == batch, "the reference forward's bias broadcast requires n == batch"
        bias_rows = bias.shape[0]
        b_b = jnp.dtype(bias.dtype).itemsize
    else:
        bias_rows, b_b = 0, 0

    dtypes = [x.dtype, weight.dtype] + ([bias.dtype] if has_bias else [])
    out_dtype = jnp.result_type(*dtypes)
    use_scratch = out_dtype != jnp.float32

    x_b = jnp.dtype(x.dtype).itemsize
    w_b = jnp.dtype(weight.dtype).itemsize
    o_b = jnp.dtype(out_dtype).itemsize

    cap = _vmem_capacity_bytes()
    budget = min(int(cap * 0.70), 100 * 1024 * 1024)
    two_tc_hint = cap <= 80 * 1024 * 1024  # v7x-like: 64 MiB/TC, 2 TensorCores

    bn, tk, tn = _choose_tiles(n, batch, in_features, out_features,
                               x_b, w_b, o_b, bias_rows, b_b,
                               has_bias, use_scratch, budget, two_tc_hint)

    est = _vmem_estimate(bn, batch, tk, tn, x_b, w_b, o_b, bias_rows, b_b,
                         has_bias, use_scratch)
    vmem_limit = min(max(int(cap * 0.85), est + (8 << 20)), int(cap * 0.95))

    # Glue: lay x out as (n, batch, in) so every in-kernel access is a plain
    # leading-dim slice (cheap next to the weight stream when batch <= out).
    # TODO(synk): fold this transpose into the kernel (non-leading batch dims in
    # dot_general / in-kernel einshape) when batch >> out_features.
    x_t = jnp.transpose(x, (1, 0, 2))

    grid = (n // bn, out_features // tn, in_features // tk)

    in_specs = [
        pl.BlockSpec((bn, batch, tk), lambda i, j, k: (i, 0, k)),
        pl.BlockSpec((bn, tk, tn), lambda i, j, k: (i, k, j)),
    ]
    inputs = [x_t, weight]
    if has_bias:
        in_specs.append(pl.BlockSpec((bias_rows, tn), lambda i, j, k: (0, j)))
        inputs.append(bias)

    scratch_shapes = []
    if use_scratch:
        scratch_shapes.append(pltpu.VMEM((bn, batch, tn), jnp.float32))

    out = pl.pallas_call(
        _make_kernel(has_bias, use_scratch),
        out_shape=jax.ShapeDtypeStruct((n, batch, out_features), out_dtype),
        grid_spec=pltpu.PrefetchScalarGridSpec(
            num_scalar_prefetch=0,
            grid=grid,
            in_specs=in_specs,
            out_specs=pl.BlockSpec((bn, batch, tn), lambda i, j, k: (i, 0, j)),
            scratch_shapes=scratch_shapes,
        ),
        compiler_params=pltpu.CompilerParams(
            dimension_semantics=("parallel", "parallel", "arbitrary"),
            vmem_limit_bytes=int(vmem_limit),
        ),
    )(*inputs)
    return out


def init_params(key, n, in_features, out_features, dtype=jnp.float32):
    # Matches reset_parameters: uniform(-in_features**-0.5, +in_features**-0.5)
    d_in_rsqrt = in_features ** (-0.5)
    kw, kb = jax.random.split(key)
    weight = jax.random.uniform(
        kw, (n, in_features, out_features), dtype=dtype,
        minval=-d_in_rsqrt, maxval=d_in_rsqrt)
    bias = jax.random.uniform(
        kb, (n, out_features), dtype=dtype,
        minval=-d_in_rsqrt, maxval=d_in_rsqrt)
    return weight, bias


if __name__ == "__main__":
    # Small, lane-dense shapes; batch == n as required by the reference's bias broadcast.
    batch, n, in_features, out_features = 8, 8, 128, 128

    key = jax.random.PRNGKey(0)
    k_x, k_p = jax.random.split(key)
    x = jax.random.normal(k_x, (batch, n, in_features), dtype=jnp.float32)
    weight, bias = init_params(k_p, n, in_features, out_features)

    # Pure-JAX reference (exact reproduction of the torch forward).
    x_t = jnp.transpose(x, (1, 0, 2))
    ref = jnp.einsum("nbi,nio->nbo", x_t, weight,
                     precision=jax.lax.Precision.HIGHEST) + bias
    ref_nb = jnp.einsum("nbi,nio->nbo", x_t, weight,
                        precision=jax.lax.Precision.HIGHEST)

    out = jax.block_until_ready(nlinear_forward(x, weight, bias))
    assert out.shape == (n, batch, out_features)
    assert jnp.allclose(out, ref, atol=1e-4, rtol=1e-4), \
        float(jnp.max(jnp.abs(out - ref)))

    # Exercise the no-bias kernel variant as well.
    out_nb = jax.block_until_ready(nlinear_forward(x, weight, None))
    assert jnp.allclose(out_nb, ref_nb, atol=1e-4, rtol=1e-4), \
        float(jnp.max(jnp.abs(out_nb - ref_nb)))

    print("KERNEL_OK")
</pallas_src>

<mosaic_0001>
module attributes {stable_mosaic.version = 11 : i64} {
  func.func @kernel(%arg0: i32, %arg1: i32, %arg2: i32, %arg3: memref<4x8x128xf32, #tpu.memory_space<vmem>>, %arg4: memref<4x128x128xf32, #tpu.memory_space<vmem>>, %arg5: memref<8x128xf32, #tpu.memory_space<vmem>>, %arg6: memref<4x8x128xf32, #tpu.memory_space<vmem>>) attributes {dimension_semantics = [#tpu.dimension_semantics<parallel>, #tpu.dimension_semantics<parallel>, #tpu.dimension_semantics<arbitrary>], iteration_bounds = array<i64: 2, 1, 1>, scalar_prefetch = 0 : i64, scratch_operands = 0 : i64, tpu.core_type = #tpu.core_type<tc>, window_params = [{transform_indices = @transform_0, window_bounds = array<i64: 4, 8, 128>}, {transform_indices = @transform_1, window_bounds = array<i64: 4, 128, 128>}, {transform_indices = @transform_2, window_bounds = array<i64: 8, 128>}, {transform_indices = @transform_3, window_bounds = array<i64: 4, 8, 128>}]} {
    %c0_i32 = arith.constant 0 : i32
    %0 = arith.cmpi eq, %arg2, %c0_i32 : i32
    %1 = arith.extui %0 : i1 to i32
    %c0_i32_0 = arith.constant 0 : i32
    %2 = arith.cmpi ne, %1, %c0_i32_0 : i32
    scf.if %2 {
      %c0_12 = arith.constant 0 : index
      %c0_13 = arith.constant 0 : index
      %9 = vector.load %arg5[%c0_12, %c0_13] : memref<8x128xf32, #tpu.memory_space<vmem>>, vector<8x128xf32>
      %10 = vector.shape_cast %9 : vector<8x128xf32> to vector<1x8x128xf32>
      %11 = vector.shape_cast %10 : vector<1x8x128xf32> to vector<1x8x128xf32>
      %12 = vector.broadcast %11 : vector<1x8x128xf32> to vector<4x8x128xf32>
      %c0_14 = arith.constant 0 : index
      %c0_15 = arith.constant 0 : index
      %c0_16 = arith.constant 0 : index
      %13 = vector.load %arg6[%c0_14, %c0_15, %c0_16] : memref<4x8x128xf32, #tpu.memory_space<vmem>>, vector<4x8x128xf32>
      tpu.vector_store %arg6[%c0_14, %c0_15, %c0_16], %12 {strides = array<i32>} : memref<4x8x128xf32, #tpu.memory_space<vmem>>, vector<4x8x128xf32>,
    } else {
    }
    %c0 = arith.constant 0 : index
    %c0_1 = arith.constant 0 : index
    %c0_2 = arith.constant 0 : index
    %3 = vector.load %arg6[%c0, %c0_1, %c0_2] : memref<4x8x128xf32, #tpu.memory_space<vmem>>, vector<4x8x128xf32>
    %c0_3 = arith.constant 0 : index
    %c0_4 = arith.constant 0 : index
    %c0_5 = arith.constant 0 : index
    %4 = vector.load %arg3[%c0_3, %c0_4, %c0_5] : memref<4x8x128xf32, #tpu.memory_space<vmem>>, vector<4x8x128xf32>
    %c0_6 = arith.constant 0 : index
    %c0_7 = arith.constant 0 : index
    %c0_8 = arith.constant 0 : index
    %5 = vector.load %arg4[%c0_6, %c0_7, %c0_8] : memref<4x128x128xf32, #tpu.memory_space<vmem>>, vector<4x128x128xf32>
    %cst = arith.constant dense<0.000000e+00> : vector<4x8x128xf32>
    %6 = tpu.matmul %4, %5, %cst {dimension_numbers = #tpu.dot_dimension_numbers<[2], [1], [1], [2], [0, 0, 0, 1, 1, 2], [0], [0]>} : vector<4x8x128xf32>, vector<4x128x128xf32>, vector<4x8x128xf32> -> vector<4x8x128xf32>
    %7 = arith.addf %3, %6 : vector<4x8x128xf32>
    %c0_9 = arith.constant 0 : index
    %c0_10 = arith.constant 0 : index
    %c0_11 = arith.constant 0 : index
    %8 = vector.load %arg6[%c0_9, %c0_10, %c0_11] : memref<4x8x128xf32, #tpu.memory_space<vmem>>, vector<4x8x128xf32>
    tpu.vector_store %arg6[%c0_9, %c0_10, %c0_11], %7 {strides = array<i32>} : memref<4x8x128xf32, #tpu.memory_space<vmem>>, vector<4x8x128xf32>,
    return
  }
  func.func @transform_0(%arg0: i32, %arg1: i32, %arg2: i32) -> (i32, i32, i32) {
    %c0_i32 = arith.constant 0 : i32
    %c0_i32_0 = arith.constant 0 : i32
    return %arg0, %c0_i32, %arg2 : i32, i32, i32
  }
  func.func @transform_1(%arg0: i32, %arg1: i32, %arg2: i32) -> (i32, i32, i32) {
    %c0_i32 = arith.constant 0 : i32
    return %arg0, %arg2, %arg1 : i32, i32, i32
  }
  func.func @transform_2(%arg0: i32, %arg1: i32, %arg2: i32) -> (i32, i32) {
    %c0_i32 = arith.constant 0 : i32
    %c0_i32_0 = arith.constant 0 : i32
    return %c0_i32, %arg1 : i32, i32
  }
  func.func @transform_3(%arg0: i32, %arg1: i32, %arg2: i32) -> (i32, i32, i32) {
    %c0_i32 = arith.constant 0 : i32
    %c0_i32_0 = arith.constant 0 : i32
    return %arg0, %c0_i32, %arg1 : i32, i32, i32
  }
}

</mosaic_0001>

<bundles_post_ra>
// kernel: tpu_custom_call.1
= control target key start
LH: loop header
LB: loop body
LE: loop exit
PB: predicated region body
PF: predicated region fallthrough
CT: control target
= control target key end

     0   :  { %s1810_s0 = inlined_call_operand.hbm [shape: f32[8,8,128], index: 0, kind: input, shape index: {}]   ;;  %s1811_s1 = inlined_call_operand.hbm [shape: f32[8,128,128], index: 1, kind: input, shape index: {}]   ;;  %s1812_s2 = inlined_call_operand.hbm [shape: f32[8,128], index: 2, kind: input, shape index: {}]   ;;  %s1813_s3 = inlined_call_operand.hbm [shape: f32[8,8,128], index: 3, kind: output, shape index: {}]  }
   0x1   :  { %1820 = sst [smem:[#allocation14_spill]] %s1810_s0 }
   0x2   :  { %1821 = sst [smem:[#allocation15_spill]] %s1812_s2 }
   0x3   :  { %8 = vsyncpa [#allocation3], 0 }
   0x4   :  { %10 = vsyncpa [#allocation3 + $0x1], 0 }
   0x5   :  { %11 = vsyncpa [#allocation6], 0 }
   0x6   :  { %13 = vsyncpa [#allocation6 + $0x1], 0 }
   0x7   :  { %14 = vsyncpa [#allocation4], 0 }
   0x8   :  { %16 = vsyncpa [#allocation4 + $0x1], 0  ;;  %s1420_s12 = smov 0   ;;  %s1422_s13 = smov 0  }
   0x9   :  { %s1424_s14 = smov 0   ;;  %s1426_s15 = smov 0  }
   0xa   :  { %s1428_s16 = smov 0   ;;  %s1430_s17 = smov 0  }
   0xb LB: > { %s1451_s18 = sadd.s32 4294967295, %s1387_s17   ;;  %s795_s19 = sadd.s32 4294967294, %s1387_s17   ;;  %s1387_s17 = sphi %s1430_s17, %s22_s17   ;;  %s1383_s16 = sphi %s1428_s16, %s1848_s16   ;;  %s1379_s15 = sphi %s1426_s15, %s1847_s15   ;;  %s1375_s14 = sphi %s1424_s14, %s1846_s14   ;;  %s1371_s13 = sphi %s1422_s13, %s1845_s13   ;;  %s1367_s12 = sphi %s1420_s12, %s1844_s12  }
   0xc   : > { %s50_s20 = sadd.s32 1, %s1375_s14  ;;  %p57_p0 = scmp.ne.s32.totalorder %s1375_s14, %s1371_s13 }
   0xd   : > { %p58_p1 = scmp.eq.s32.totalorder %s1387_s17, 0  ;;  %p63_p2 = scmp.ne.s32.totalorder %s1371_s13, %s1367_s12 }
   0xe   : > { %p1814_p3 = scmp.eq.s32.totalorder %s1451_s18, 0  ;;  %p145_p4 = scmp.eq.s32.totalorder %s1451_s18, 1 }
   0xf   : > { %p1462_p5 = por %p58_p1, %p57_p0  ;;  %p151_p6 = scmp.eq.s32.totalorder %s795_s19, 1 }
  0x10   : > { %p1468_p7 = por %p1814_p3, %p63_p2  ;;  %p1472_p8 = por %p145_p4, %p57_p0 }
  0x11   : > { %p1476_p9 = por %p151_p6, %p63_p2  ;;  %p796_p10 = scmp.ge.s32.totalorder %s1387_s17, 1 }
  0x12   : > { %s1823_s22 = scalar_select %p1468_p7, 1, 0 }
  0x13   : > { %s1824_s23 = scalar_select %p1472_p8, 1, 0 }
  0x14   : > { %s1825_s24 = scalar_select %p1476_p9, 1, 0 }
  0x15   : > { %p158_p11 = scmp.lt.s32.totalorder %s1387_s17, 3  ;;  %s1389_s26 = smov [#allocation7]  }
  0x16   : > { %s173_s27 = sshll.u32 %s1389_s26, 4  ;;  %p1150_p1 = scmp.lt.s32.totalorder %s1387_s17, 2  ;;  %s174_s27 = int_to_ptr.vmem [resolvable:$true] %s173_s27 }
  0x17   : > { %p1483_p13 = pnand %p796_p10, %p158_p11  ;;  %s41_s30 = sadd.s32 1, %s1383_s16 }
  0x18   : > { %p1492_p4 = pnand %p1150_p1, %p1462_p5  ;;  %p1503_p6 = scmp.ge.s32.totalorder %s41_s30, 2 }
  0x19   : > { %s1826_s25 = scalar_select %p1483_p13, 1, 0 }
  0x1a   : > { %p1134_p0 = pneg %p1483_p13  ;;  %s1508_s5 = sand.u32 1, %s1375_s14  }
  0x1b   : > { %s1827_s28 = scalar_select %p1492_p4, 1, 0 }
  0x1c   : > { %p1498_p2 = pnand %p1134_p0, %p1814_p3  ;;  %s1830_s2 = sld [smem:[#allocation15_spill]] }
  0x1d   : > { %s1829_s4 = scalar_select %p1503_p6, 1, 0 }
  0x1e   : > { %p1211_p10 = pneg %p1498_p2 }
  0x22   : > { %s1209_s8 = scalar_lea.hbm %s1830_s2, 128 }
  0x23   : > { %p1210_p5 = scmp.ne.s32.totalorder %s1830_s2, %s1209_s8  ;;  %p1216_p0 = scmp.lt.u32.totalorder %s1209_s8, %s1830_s2 }
  0x25   : > { %p1212_p11 = pnand %p1211_p10, %p1210_p5 }
  0x27   : > { %p1213_p1 = pneg %p1212_p11 }
  0x29   : > { %p1218_p12 = pnand %p1216_p0, %p1213_p1 }
  0x2b   : > { %1221 = shalt.err (!%p1218_p12)
}
  0x2c   : > { %s1222_s21 = scalar_lea.vmem %s174_s27, 128  ;;  %p1230_p7 = scmp.lt.s32.totalorder %s174_s27, %s174_s27 }
  0x2d   : > { %p1223_p3 = scmp.ne.s32.totalorder %s174_s27, %s1222_s21  ;;  %p1231_p13 = scmp.lt.s32.totalorder %s1222_s21, %s1222_s21 }
  0x2f   : > { %p1225_p9 = pnand %p1223_p3, %p1211_p10  ;;  %p1232_p4 = por %p1231_p13, %p1230_p7 }
  0x31   : > { %p1226_p8 = pneg %p1225_p9 }
  0x33   : > { %p1233_p6 = pnand %p1232_p4, %p1226_p8 }
  0x35   : > { %1236 = shalt.err (!%p1233_p6)
}
  0x36   : > { %1137 = dma.hbm_to_vmem [thread:$0]  (!%p1498_p2), %s1830_s2, 128, %s174_s27, [#allocation6]  }
  0x37   : > { %p1831_p3 = scmp.ne.s32.totalorder %s1829_s4, 0  ;;  %s799_s7 = sshll.u32 %s1508_s5, 5 }
  0x38   : > { %s816_s8 = sshll.u32 %s1383_s16, 9  ;;  %s1833_s0 = sld [smem:[#allocation14_spill]] }
  0x39   : > { %s1850_s30 = smov (%p1831_p3, %s41_s30), 0  ;;  %s188_s19 = scalar_lea.vmem [#allocation2], %s799_s7 }
  0x3a   : > { %1832 = sst [smem:[#allocation13_spill]] %s1850_s30  ;;  %s45_s29 = ssub.s32 %s1383_s16, %s1850_s30 }
  0x3b   : > { %p48_p7 = scmp.eq.s32.totalorder %s45_s29, 0  ;;  %s196_s27 = sshll.u32 %s188_s19, 4  ;;  %s1544_s27 = int_to_ptr.vmem [resolvable:$true] %s196_s27 }
  0x3c   : > { %s185_s26 = scalar_lea.sflag [#allocation3], %s1508_s5  ;;  %p1834_p9 = scmp.ne.s32.totalorder %s1827_s28, 0 }
  0x3d   : > { %s1542_s4 = scalar_select %p48_p7, %s1375_s14, %s50_s20  }
  0x3e   : > { %s1537_s11 = scalar_lea.hbm %s1833_s0, %s816_s8  ;;  %p1239_p12 = pneg %p1834_p9 }
  0x3f   : > { %s1237_s6 = scalar_lea.hbm %s1537_s11, 512  ;;  %s1242_s7 = scalar_lea.hbm %s1833_s0, 1024 }
  0x40   : > { %p1238_p8 = scmp.ne.s32.totalorder %s1537_s11, %s1237_s6  ;;  %p1243_p2 = scmp.lt.u32.totalorder %s1537_s11, %s1833_s0 }
  0x41   : > { %p1244_p6 = scmp.lt.u32.totalorder %s1242_s7, %s1237_s6  ;;  %p1246_p10 = scmp.lt.u32.totalorder %s1237_s6, %s1537_s11 }
  0x42   : > { %p1240_p13 = pnand %p1239_p12, %p1238_p8 }
  0x43   : > { %p1245_p5 = por %p1244_p6, %p1243_p2 }
  0x44   : > { %p1241_p4 = pneg %p1240_p13 }
  0x45   : > { %p1247_p11 = por %p1246_p10, %p1245_p5 }
  0x47   : > { %p1248_p1 = pnand %p1247_p11, %p1241_p4 }
  0x49   : > { %1251 = shalt.err (!%p1248_p1)
}
  0x4a   : > { %s1252_s20 = scalar_lea.vmem %s1544_s27, 512  ;;  %s1390_s19 = smov [#allocation2]  }
  0x4b   : > { %p1253_p0 = scmp.ne.s32.totalorder %s1544_s27, %s1252_s20  ;;  %s1257_s29 = sshll.u32 %s1390_s19, 4  ;;  %s1258_s29 = int_to_ptr.vmem [resolvable:$false] %s1257_s29 }
  0x4c   : > { %s1259_s8 = scalar_lea.vmem %s1258_s29, 1024  ;;  %p1260_p8 = scmp.lt.s32.totalorder %s1544_s27, %s1258_s29 }
  0x4d   : > { %p1255_p3 = pnand %p1253_p0, %p1239_p12  ;;  %p1261_p13 = scmp.lt.s32.totalorder %s1259_s8, %s1252_s20 }
  0x4f   : > { %p1256_p7 = pneg %p1255_p3  ;;  %p1262_p2 = por %p1261_p13, %p1260_p8 }
  0x51   : > { %p1263_p6 = pnand %p1262_p2, %p1256_p7 }
  0x53   : > { %1266 = shalt.err (!%p1263_p6)
}
  0x54   : > { %s1391_s6 = smov 128   ;;  %s1392_s7 = smov 8  }
  0x55   : > { %1141 = dma.hbm_to_vmem [thread:$0]  (!%p1834_p9), %s1537_s11, 512, %s1544_s27, %s185_s26, %s1391_s6, %s1391_s6, %s1392_s7  }
  0x56   : > { %s802_s9 = sshll.u32 %s1508_s5, 9  ;;  %s818_s10 = sshll.u32 %s1383_s16, 13 }
  0x57   : > { %s1583_s29 = scalar_lea.hbm %s1811_s1, %s818_s10  ;;  %s210_s8 = scalar_lea.vmem [#allocation5], %s802_s9 }
  0x58   : > { %s221_s21 = sshll.u32 %s210_s8, 4  ;;  %s1835_s0 = sand.u32 1, %s1387_s17   ;;  %s1585_s21 = int_to_ptr.vmem [resolvable:$true] %s221_s21 }
  0x59   : > { %s1589_s2 = scalar_lea.sflag [#allocation6], %s1835_s0  ;;  %s1267_s30 = scalar_lea.hbm %s1583_s29, 8192 }
  0x5a   : > { %p1268_p4 = scmp.ne.s32.totalorder %s1583_s29, %s1267_s30  ;;  %s1272_s27 = scalar_lea.hbm %s1811_s1, 16384 }
  0x5b   : > { %p1273_p11 = scmp.lt.u32.totalorder %s1583_s29, %s1811_s1  ;;  %p1274_p1 = scmp.lt.u32.totalorder %s1272_s27, %s1267_s30 }
  0x5c   : > { %p1270_p5 = pnand %p1268_p4, %p1239_p12  ;;  %p1276_p3 = scmp.lt.u32.totalorder %s1267_s30, %s1583_s29 }
  0x5d   : > { %p1275_p0 = por %p1274_p1, %p1273_p11 }
  0x5e   : > { %p1271_p10 = pneg %p1270_p5 }
  0x5f   : > { %p1277_p7 = por %p1276_p3, %p1275_p0 }
  0x61   : > { %p1278_p8 = pnand %p1277_p7, %p1271_p10 }
  0x63   : > { %1281 = shalt.err (!%p1278_p8)
}
  0x64   : > { %s1282_s0 = scalar_lea.vmem %s1585_s21, 8192  ;;  %s1393_s9 = smov [#allocation5]  }
  0x65   : > { %p1283_p13 = scmp.ne.s32.totalorder %s1585_s21, %s1282_s0  ;;  %s1287_s20 = sshll.u32 %s1393_s9, 4  ;;  %s1288_s20 = int_to_ptr.vmem [resolvable:$false] %s1287_s20 }
  0x66   : > { %s1289_s19 = scalar_lea.vmem %s1288_s20, 16384  ;;  %p1290_p4 = scmp.lt.s32.totalorder %s1585_s21, %s1288_s20 }
  0x67   : > { %p1285_p2 = pnand %p1283_p13, %p1239_p12  ;;  %p1291_p5 = scmp.lt.s32.totalorder %s1289_s19, %s1282_s0 }
  0x69   : > { %p1286_p6 = pneg %p1285_p2  ;;  %p1292_p11 = por %p1291_p5, %p1290_p4 }
  0x6b   : > { %p1293_p1 = pnand %p1292_p11, %p1286_p6 }
  0x6d   : > { %1296 = shalt.err (!%p1293_p1)
}
  0x6e   : > { %1144 = dma.hbm_to_vmem [thread:$0]  (!%p1834_p9), %s1583_s29, 8192, %s1585_s21, %s1589_s2, %s1391_s6, %s1391_s6, %s1392_s7  }
  0x6f   : > { %p1836_p12 = scmp.ne.s32.totalorder %s1826_s25, 0 }
  0x70   : > { %s1621_s30 = sand.u32 (!%p1836_p12), 1, %s1371_s13   ;;  %p1837_p10 = scmp.ne.s32.totalorder (!%p1836_p12), %s1823_s22, 0 }
  0x71   : > { %233 = sbr.rel (%p1836_p12) target bundleno = 423 (0x1a7), region = 32  ;;  %s807_s8 = sshll.u32 (!%p1836_p12), %s1621_s30, 5 }
  0x72   : > { %s236_s5 = scalar_lea.sflag (!%p1836_p12), [#allocation3], %s1621_s30  ;;  %s1627_s28 = scalar_lea.vmem (!%p1836_p12), [#allocation2], %s807_s8 }
  0x78   : > { %1350 = dma.done.wait (%p1837_p10), %s236_s5, 512  }
  0x79   : > { %1352 = vsyncadd (%p1837_p10), %s236_s5, 4294966784  ;;  %s244_s2 = sand.u32 1, %s1451_s18   ;;  %s808_s25 = sshll.u32 %s1621_s30, 9 }
  0x7a   : > { %s245_s21 = scalar_lea.sflag [#allocation6], %s244_s2  ;;  %s1635_s6 = scalar_lea.vmem [#allocation5], %s808_s25 }
  0x7b   : > { %1354 = dma.done.wait (%p1837_p10), %s245_s21, 8192  }
  0x7c   : > { %1356 = vsyncadd (%p1837_p10), %s245_s21, 4294959104  ;;  %p1838_p9 = scmp.eq.s32.totalorder %s1451_s18, 0 }
  0x7e   : > { %1358 = dma.done.wait (%p1838_p9), [#allocation6], 128   ;;  %p1839_p0 = pmov %p1838_p9 }
  0x7f   : > { %v1394_v0 = vmov 0.0|0.0   ;;  %vm1395_vm0 = vmmov 0   ;;  %v1396_v1 = vmov 0.0   ;;  %v301_v2 = vld [vmem:[%s1635_s6] sm:$0xff]  ;;  %v302_v3 = vld [vmem:[%s1635_s6 + $0x8] sm:$0xff]  ;;  %v303_v7 = vld [vmem:[%s1635_s6 + $0x10] sm:$0xff] }
  0x80   : > { %1360 = vsyncadd (%p1839_p0), [#allocation6], 4294967168  ;;  %1028 = vmatprep.subr.bf16.mxu0 %v1394_v0  ;;  %1052 = vmatprep.subr.bf16.mxu1 %v1394_v0  ;;  %v317_v4 = vld [vmem:[%s1635_s6 + $0x80] sm:$0xff]  ;;  %v1029_v5 = vpack.c.bf16 %v302_v3, %v301_v2  ;;  %v318_v6 = vld [vmem:[%s1635_s6 + $0x88] sm:$0xff]  ;;  %s279_s18 = scalar_lea.vmem [#allocation8], %s807_s8  ;;  %s819_s22 = sshll.u32 %s1379_s15, 9 }
  0x81   : > { %920 = vmatprep.mubr.msk.f32.mxu0 %vm1395_vm0, %v1396_v1  ;;  %955 = vmatprep.mubr.msk.f32.mxu1 %vm1395_vm0, %v1396_v1  ;;  %v304_v8 = vld [vmem:[%s1635_s6 + $0x18] sm:$0xff]  ;;  %v1053_v9 = vpack.c.bf16 %v318_v6, %v317_v4  ;;  %v319_v10 = vld [vmem:[%s1635_s6 + $0x90] sm:$0xff]  ;;  %v305_v14 = vld [vmem:[%s1635_s6 + $0x20] sm:$0xff]  ;;  %s668_s7 = sshll.u32 %s279_s18, 4  ;;  %s1759_s27 = scalar_lea.hbm %s1813_s3, %s819_s22  ;;  %s1761_s7 = int_to_ptr.vmem [resolvable:$true] %s668_s7 }
  0x82   : > { %v320_v11 = vld [vmem:[%s1635_s6 + $0x98] sm:$0xff]  ;;  %1030 = vmatpush3.bf16.msra.mxu0 %v1029_v5  ;;  %v1032_v12 = vpack.c.bf16 %v304_v8, %v303_v7  ;;  %v306_v15 = vld [vmem:[%s1635_s6 + $0x28] sm:$0xff]  ;;  %v321_v16 = vld [vmem:[%s1635_s6 + $0xa0] sm:$0xff]  ;;  %s654_s15 = scalar_lea.sflag [#allocation4], %s1621_s30  ;;  %s1297_s26 = scalar_lea.vmem %s1761_s7, 512 }
  0x83   : > { %1054 = vmatpush3.bf16.msra.mxu1 %v1053_v9  ;;  %1031 = vmatprep.subr.bf16.mxu0 %v1394_v0  ;;  %v1056_v13 = vpack.c.bf16 %v320_v11, %v319_v10  ;;  %v322_v17 = vld [vmem:[%s1635_s6 + $0xa8] sm:$0xff]  ;;  %v1035_v18 = vpack.c.bf16 %v306_v15, %v305_v14  ;;  %v307_v20 = vld [vmem:[%s1635_s6 + $0x30] sm:$0xff]  ;;  %v308_v21 = vld [vmem:[%s1635_s6 + $0x38] sm:$0xff]  ;;  %p1298_p3 = scmp.ne.s32.totalorder %s1761_s7, %s1297_s26  ;;  %p1840_p7 = scmp.ne.s32.totalorder %s1824_s23, 0 }
  0x84   : > { %1055 = vmatprep.subr.bf16.mxu1 %v1394_v0  ;;  %v1059_v19 = vpack.c.bf16 %v322_v17, %v321_v16  ;;  %v323_v22 = vld [vmem:[%s1635_s6 + $0xb0] sm:$0xff]  ;;  %v324_v23 = vld [vmem:[%s1635_s6 + $0xb8] sm:$0xff]  ;;  %v1038_v24 = vpack.c.bf16 %v308_v21, %v307_v20  ;;  %v309_v26 = vld [vmem:[%s1635_s6 + $0x40] sm:$0xff]  ;;  %s1397_s10 = smov [#allocation8]  }
  0x85   : > { %v1062_v25 = vpack.c.bf16 %v324_v23, %v323_v22  ;;  %v310_v27 = vld [vmem:[%s1635_s6 + $0x48] sm:$0xff]  ;;  %v325_v28 = vld [vmem:[%s1635_s6 + $0xc0] sm:$0xff]  ;;  %v311_v32 = vld [vmem:[%s1635_s6 + $0x50] sm:$0xff]  ;;  %p1299_p8 = pnand %p1298_p3, %p1840_p7  ;;  %s1301_s0 = sshll.u32 %s1397_s10, 4  ;;  %s1302_s0 = int_to_ptr.vmem [resolvable:$false] %s1301_s0 }
  0x86   : > { %1033 = vmatpush3.bf16.msra.mxu0 %v1032_v12  ;;  %v326_v29 = vld [vmem:[%s1635_s6 + $0xc8] sm:$0xff]  ;;  %v1041_v30 = vpack.c.bf16 %v310_v27, %v309_v26  ;;  %v312_v33 = vld [vmem:[%s1635_s6 + $0x58] sm:$0xff]  ;;  %v327_v34 = vld [vmem:[%s1635_s6 + $0xd0] sm:$0xff]  ;;  %s1303_s9 = scalar_lea.vmem %s1302_s0, 1024  ;;  %p1304_p2 = scmp.lt.s32.totalorder %s1761_s7, %s1302_s0 }
  0x87   : > { %1057 = vmatpush3.bf16.msra.mxu1 %v1056_v13  ;;  %1034 = vmatprep.subr.bf16.mxu0 %v1394_v0  ;;  %v1065_v31 = vpack.c.bf16 %v326_v29, %v325_v28  ;;  %v328_v35 = vld [vmem:[%s1635_s6 + $0xd8] sm:$0xff]  ;;  %v1044_v36 = vpack.c.bf16 %v312_v33, %v311_v32  ;;  %v313_v38 = vld [vmem:[%s1635_s6 + $0x60] sm:$0xff]  ;;  %v314_v39 = vld [vmem:[%s1635_s6 + $0x68] sm:$0xff]  ;;  %p1300_p13 = pneg %p1299_p8  ;;  %p1305_p6 = scmp.lt.s32.totalorder %s1303_s9, %s1297_s26 }
  0x88   : > { %1058 = vmatprep.subr.bf16.mxu1 %v1394_v0  ;;  %v1068_v37 = vpack.c.bf16 %v328_v35, %v327_v34  ;;  %v329_v40 = vld [vmem:[%s1635_s6 + $0xe0] sm:$0xff]  ;;  %v330_v41 = vld [vmem:[%s1635_s6 + $0xe8] sm:$0xff]  ;;  %v1047_v42 = vpack.c.bf16 %v314_v39, %v313_v38  ;;  %v315_v44 = vld [vmem:[%s1635_s6 + $0x70] sm:$0xff] }
  0x89   : > { %v1071_v43 = vpack.c.bf16 %v330_v41, %v329_v40  ;;  %v316_v45 = vld [vmem:[%s1635_s6 + $0x78] sm:$0xff]  ;;  %v331_v46 = vld [vmem:[%s1635_s6 + $0xf0] sm:$0xff]  ;;  %v333_v50 = vld [vmem:[%s1635_s6 + $0x100] sm:$0xff]  ;;  %p1306_p4 = por %p1305_p6, %p1304_p2 }
  0x8a   : > { %1036 = vmatpush3.bf16.msra.mxu0 %v1035_v18  ;;  %v332_v47 = vld [vmem:[%s1635_s6 + $0xf8] sm:$0xff]  ;;  %v1050_v48 = vpack.c.bf16 %v316_v45, %v315_v44  ;;  %v334_v51 = vld [vmem:[%s1635_s6 + $0x108] sm:$0xff]  ;;  %v349_v52 = vld [vmem:[%s1635_s6 + $0x180] sm:$0xff] }
  0x8b   : > { %1060 = vmatpush3.bf16.msra.mxu1 %v1059_v19  ;;  %1037 = vmatprep.subr.bf16.mxu0 %v1394_v0  ;;  %v1074_v49 = vpack.c.bf16 %v332_v47, %v331_v46  ;;  %v350_v53 = vld [vmem:[%s1635_s6 + $0x188] sm:$0xff]  ;;  %v297_v54 = vld [vmem:[%s1627_s28] sm:$0xff]  ;;  %v1077_v55 = vpack.c.bf16 %v334_v51, %v333_v50  ;;  %v335_v58 = vld [vmem:[%s1635_s6 + $0x110] sm:$0xff]  ;;  %p1307_p5 = pnand %p1306_p4, %p1300_p13 }
  0x8c   : > { %1061 = vmatprep.subr.bf16.mxu1 %v1394_v0  ;;  %v298_v56 = vld [vmem:[%s1627_s28 + $0x8] sm:$0xff]  ;;  %v1101_v57 = vpack.c.bf16 %v350_v53, %v349_v52  ;;  %v336_v59 = vld [vmem:[%s1635_s6 + $0x118] sm:$0xff]  ;;  %v351_v60 = vld [vmem:[%s1635_s6 + $0x190] sm:$0xff] }
  0x8d   : > { %v352_v61 = vld [vmem:[%s1635_s6 + $0x198] sm:$0xff]  ;;  %v1080_v62 = vpack.c.bf16 %v336_v59, %v335_v58  ;;  %v337_v2 = vld [vmem:[%s1635_s6 + $0x120] sm:$0xff]  ;;  %v338_v3 = vld [vmem:[%s1635_s6 + $0x128] sm:$0xff] }
  0x8e   : > { %1039 = vmatpush3.bf16.msra.mxu0 %v1038_v24  ;;  %v1104_v63 = vpack.c.bf16 %v352_v61, %v351_v60  ;;  %v353_v4 = vld [vmem:[%s1635_s6 + $0x1a0] sm:$0xff]  ;;  %v354_v5 = vld [vmem:[%s1635_s6 + $0x1a8] sm:$0xff]  ;;  %v1083_v6 = vpack.c.bf16 %v338_v3, %v337_v2  ;;  %v339_v8 = vld [vmem:[%s1635_s6 + $0x130] sm:$0xff] }
  0x8f   : > { %1063 = vmatpush3.bf16.msra.mxu1 %v1062_v25  ;;  %1040 = vmatprep.subr.bf16.mxu0 %v1394_v0  ;;  %v1107_v7 = vpack.c.bf16 %v354_v5, %v353_v4  ;;  %v340_v9 = vld [vmem:[%s1635_s6 + $0x138] sm:$0xff]  ;;  %v355_v10 = vld [vmem:[%s1635_s6 + $0x1b0] sm:$0xff]  ;;  %v341_v13 = vld [vmem:[%s1635_s6 + $0x140] sm:$0xff] }
  0x90   : > { %1064 = vmatprep.subr.bf16.mxu1 %v1394_v0  ;;  %v356_v11 = vld [vmem:[%s1635_s6 + $0x1b8] sm:$0xff]  ;;  %v342_v14 = vld [vmem:[%s1635_s6 + $0x148] sm:$0xff]  ;;  %v357_v15 = vld [vmem:[%s1635_s6 + $0x1c0] sm:$0xff] }
  0x91   : > { %v1110_v12 = vpack.c.bf16 %v356_v11, %v355_v10  ;;  %v358_v16 = vld [vmem:[%s1635_s6 + $0x1c8] sm:$0xff]  ;;  %v1089_v17 = vpack.c.bf16 %v342_v14, %v341_v13  ;;  %v343_v19 = vld [vmem:[%s1635_s6 + $0x150] sm:$0xff]  ;;  %v344_v20 = vld [vmem:[%s1635_s6 + $0x158] sm:$0xff] }
  0x92   : > { %1042 = vmatpush3.bf16.msra.mxu0 %v1041_v30  ;;  %v1113_v18 = vpack.c.bf16 %v358_v16, %v357_v15  ;;  %v359_v21 = vld [vmem:[%s1635_s6 + $0x1d0] sm:$0xff]  ;;  %v360_v22 = vld [vmem:[%s1635_s6 + $0x1d8] sm:$0xff]  ;;  %v1092_v23 = vpack.c.bf16 %v344_v20, %v343_v19  ;;  %v345_v25 = vld [vmem:[%s1635_s6 + $0x160] sm:$0xff] }
  0x93   : > { %1066 = vmatpush3.bf16.msra.mxu1 %v1065_v31  ;;  %1043 = vmatprep.subr.bf16.mxu0 %v1394_v0  ;;  %v1116_v24 = vpack.c.bf16 %v360_v22, %v359_v21  ;;  %v346_v26 = vld [vmem:[%s1635_s6 + $0x168] sm:$0xff]  ;;  %v361_v27 = vld [vmem:[%s1635_s6 + $0x1e0] sm:$0xff]  ;;  %v347_v31 = vld [vmem:[%s1635_s6 + $0x170] sm:$0xff] }
  0x94   : > { %1067 = vmatprep.subr.bf16.mxu1 %v1394_v0  ;;  %v362_v28 = vld [vmem:[%s1635_s6 + $0x1e8] sm:$0xff]  ;;  %v1095_v29 = vpack.c.bf16 %v346_v26, %v345_v25  ;;  %v348_v32 = vld [vmem:[%s1635_s6 + $0x178] sm:$0xff]  ;;  %v363_v33 = vld [vmem:[%s1635_s6 + $0x1f0] sm:$0xff] }
  0x95   : > { %v1119_v30 = vpack.c.bf16 %v362_v28, %v361_v27  ;;  %v364_v34 = vld [vmem:[%s1635_s6 + $0x1f8] sm:$0xff]  ;;  %v1098_v35 = vpack.c.bf16 %v348_v32, %v347_v31  ;;  %v288_v39 = vld [vmem:[#allocation7] sm:$0xff] }
  0x96   : > { %1045 = vmatpush3.bf16.msra.mxu0 %v1044_v36  ;;  %v1122_v36 = vpack.c.bf16 %v364_v34, %v363_v33  ;;  %v300_v38 = vld [vmem:[%s1627_s28 + $0x18] sm:$0xff] }
  0x97   : > { %1069 = vmatpush3.bf16.msra.mxu1 %v1068_v37  ;;  %1046 = vmatprep.subr.bf16.mxu0 %v1394_v0  ;;  %v299_v37 = vld [vmem:[%s1627_s28 + $0x10] sm:$0xff] }
  0x98   : > { %1070 = vmatprep.subr.bf16.mxu1 %v1394_v0 }
  0x9a   : > { %1048 = vmatpush3.bf16.msra.mxu0 %v1047_v42 }
  0x9b   : > { %1072 = vmatpush3.bf16.msra.mxu1 %v1071_v43  ;;  %1049 = vmatprep.subr.bf16.mxu0 %v1394_v0 }
  0x9c   : > { %1073 = vmatprep.subr.bf16.mxu1 %v1394_v0 }
  0x9e   : > { %1051 = vmatpush3.bf16.msra.mxu0 %v1050_v48 }
  0x9f   : > { %1075 = vmatpush3.bf16.msra.mxu1 %v1074_v49  ;;  %1076 = vmatprep.subr.bf16.mxu0 %v1394_v0 }
  0xa0   : > { %1100 = vmatprep.subr.bf16.mxu1 %v1394_v0 }
  0xa1   : > { %921 = vmatmul.mubr.f32.vlgmr.msra.gmra.mrb[0].mxu0 %v297_v54 }
  0xa2   : > { %956 = vmatmul.mubr.f32.vlgmr.msra.gmra.mrb[0].mxu1 %v298_v56  ;;  %1078 = vmatpush3.bf16.msra.mxu0 %v1077_v55 }
  0xa3   : > { %1102 = vmatpush3.bf16.msra.mxu1 %v1101_v57  ;;  %1079 = vmatprep.subr.bf16.mxu0 %v1394_v0 }
  0xa4   : > { %1103 = vmatprep.subr.bf16.mxu1 %v1394_v0  ;;  %990 = vmatprep.mubr.msk.f32.mxu0 %vm1395_vm0, %v1396_v1 }
  0xa5   : > { %1025 = vmatprep.mubr.msk.f32.mxu1 %vm1395_vm0, %v1396_v1  ;;  %v1086_v1 = vpack.c.bf16 %v340_v9, %v339_v8 }
  0xa6   : > { %1081 = vmatpush3.bf16.msra.mxu0 %v1080_v62 }
  0xa7   : > { %1105 = vmatpush3.bf16.msra.mxu1 %v1104_v63  ;;  %1082 = vmatprep.subr.bf16.mxu0 %v1394_v0 }
  0xa8   : > { %1106 = vmatprep.subr.bf16.mxu1 %v1394_v0 }
  0xaa   : > { %1084 = vmatpush3.bf16.msra.mxu0 %v1083_v6 }
  0xab   : > { %1108 = vmatpush3.bf16.msra.mxu1 %v1107_v7  ;;  %1085 = vmatprep.subr.bf16.mxu0 %v1394_v0 }
  0xac   : > { %1109 = vmatprep.subr.bf16.mxu1 %v1394_v0 }
  0xae   : > { %1087 = vmatpush3.bf16.msra.mxu0 %v1086_v1 }
  0xaf   : > { %1111 = vmatpush3.bf16.msra.mxu1 %v1110_v12  ;;  %1088 = vmatprep.subr.bf16.mxu0 %v1394_v0 }
  0xb0   : > { %1112 = vmatprep.subr.bf16.mxu1 %v1394_v0 }
  0xb2   : > { %1090 = vmatpush3.bf16.msra.mxu0 %v1089_v17 }
  0xb3   : > { %1114 = vmatpush3.bf16.msra.mxu1 %v1113_v18  ;;  %1091 = vmatprep.subr.bf16.mxu0 %v1394_v0 }
  0xb4   : > { %1115 = vmatprep.subr.bf16.mxu1 %v1394_v0 }
  0xb6   : > { %1093 = vmatpush3.bf16.msra.mxu0 %v1092_v23 }
  0xb7   : > { %1117 = vmatpush3.bf16.msra.mxu1 %v1116_v24  ;;  %1094 = vmatprep.subr.bf16.mxu0 %v1394_v0 }
  0xb8   : > { %1118 = vmatprep.subr.bf16.mxu1 %v1394_v0 }
  0xba   : > { %1096 = vmatpush3.bf16.msra.mxu0 %v1095_v29 }
  0xbb   : > { %1120 = vmatpush3.bf16.msra.mxu1 %v1119_v30  ;;  %1097 = vmatprep.subr.bf16.mxu0 %v1394_v0 }
  0xbc   : > { %1121 = vmatprep.subr.bf16.mxu1 %v1394_v0 }
  0xbe   : > { %1099 = vmatpush3.bf16.msra.mxu0 %v1098_v35 }
  0xbf   : > { %1123 = vmatpush3.bf16.msra.mxu1 %v1122_v36 }
  0xc1   : > { %991 = vmatmul.mubr.f32.vlgmr.msra.gmra.mrb[2].mxu0 %v299_v37 }
  0xc2   : > { %1026 = vmatmul.mubr.f32.vlgmr.msra.gmra.mrb[2].mxu1 %v300_v38 }
 0x174   : > { %v431_v40 = vpop.f32.mrb[0].mxu0 }
 0x175   : > { %v645_v41 = vadd.f32 %v431_v40, %v288_v39  ;;  %v501_v42 = vpop.f32.mrb[0].mxu1  ;;  %v922_v43 = vpop.f32.mrb[1].mxu0 }
 0x176   : > { %v646_v44 = vadd.f32 %v501_v42, %v288_v39  ;;  %v957_v45 = vpop.f32.mrb[1].mxu1 }
 0x177   : > { %649 = vst [vmem:[%s279_s18] sm:$0xff] %v645_v41 }
 0x178   : > { %650 = vst [vmem:[%s279_s18 + $0x8] sm:$0xff] %v646_v44 }
 0x194   : > { %v571_v0 = vpop.f32.mrb[2].mxu0 }
 0x195   : > { %v647_v46 = vadd.f32 %v571_v0, %v288_v39  ;;  %v641_v47 = vpop.f32.mrb[2].mxu1  ;;  %v992_v48 = vpop.f32.mrb[3].mxu0 }
 0x196   : > { %v648_v49 = vadd.f32 %v641_v47, %v288_v39  ;;  %v1027_v50 = vpop.f32.mrb[3].mxu1 }
 0x197   : > { %651 = vst [vmem:[%s279_s18 + $0x10] sm:$0xff] %v647_v46 }
 0x198   : > { %652 = vst [vmem:[%s279_s18 + $0x18] sm:$0xff] %v648_v49 }
 0x199   : > { %1310 = shalt.err (!%p1307_p5)
}
 0x19a   : > { %s1311_s20 = scalar_lea.hbm %s1759_s27, 512  ;;  %s1315_s5 = scalar_lea.hbm %s1813_s3, 1024 }
 0x19b   : > { %p1312_p11 = scmp.ne.s32.totalorder %s1759_s27, %s1311_s20  ;;  %p1316_p10 = scmp.lt.u32.totalorder %s1759_s27, %s1813_s3 }
 0x19c   : > { %p1317_p9 = scmp.lt.u32.totalorder %s1315_s5, %s1311_s20  ;;  %p1319_p3 = scmp.lt.u32.totalorder %s1311_s20, %s1759_s27 }
 0x19d   : > { %p1313_p1 = pnand %p1312_p11, %p1840_p7 }
 0x19e   : > { %p1318_p0 = por %p1317_p9, %p1316_p10 }
 0x19f   : > { %p1314_p12 = pneg %p1313_p1 }
 0x1a0   : > { %p1320_p8 = por %p1319_p3, %p1318_p0 }
 0x1a2   : > { %p1321_p13 = pnand %p1320_p8, %p1314_p12 }
 0x1a4   : > { %1324 = shalt.err (!%p1321_p13)
}
 0x1a5   : > { %s1398_s25 = smov 128   ;;  %s1399_s21 = smov 8  }
 0x1a6   : > { %1132 = dma.vmem_to_hbm [thread:$0]  (%p1840_p7), %s1761_s7, 512, %s1759_s27, %s654_s15, %s1398_s25, %s1398_s25, %s1399_s21  }
 0x1a7 PF: > { %s683_s6 = sand.u32 1, %s1367_s12   ;;  %p1841_p2 = scmp.ne.s32.totalorder %s1825_s24, 0 }
 0x1a8   : > { %p1842_p6 = scmp.ge.s32.totalorder %s1387_s17, 2  ;;  %s684_s18 = scalar_lea.sflag [#allocation4], %s683_s6 }
 0x1aa   : > { %p1146_p4 = pnand %p1842_p6, %p1841_p2 }
 0x1ac   : > { %1362 = dma.done.wait (!%p1146_p4), %s684_s18, 512  }
 0x1ad   : > { %1364 = vsyncadd (!%p1146_p4), %s684_s18, 4294966784  ;;  %s22_s17 = sadd.s32 1, %s1387_s17   ;;  %s1843_s23 = sld [smem:[#allocation13_spill]] }
 0x1ae   : > { %p19_p5 = scmp.ge.s32.totalorder %s22_s17, 4   ;;  %s1844_s12 = smov %s1371_s13 }
 0x1af   : > { %s1845_s13 = smov %s1375_s14  ;;  %s1846_s14 = smov %s1542_s4 }
 0x1b0   : > { %s1847_s15 = smov %s1383_s16  ;;  %21 = sbr.rel (!%p19_p5) target bundleno = 11 (0xb), region = 99 }
 0x1b3   : > { %s1848_s16 = smov %s1843_s23 }
 0x1b7   :  { %689 = vsyncpa [#allocation3], 1 }
 0x1b8   :  { %691 = vsyncpa [#allocation3 + $0x1], 1 }
 0x1b9   :  { %692 = vsyncpa [#allocation6], 1 }
 0x1ba   :  { %694 = vsyncpa [#allocation6 + $0x1], 1 }
 0x1bb   :  { %695 = vsyncpa [#allocation4], 1 }
 0x1bc   :  { %697 = vsyncpa [#allocation4 + $0x1], 1 }

</bundles_post_ra>
